<compile_context>
chip_gen: v5e
topology: v5e:2x2
jax: 0.10.0
libtpu: 0.0.40
codegen_flags: <defaults>
</compile_context>

<pallas_src>
import jax
import jax.numpy as jnp
import numpy as np
from jax.experimental import pallas as pl
from jax.experimental.pallas import tpu as pltpu

_OUT_PAD = 128   # lane-dense output width (true output width is 13)
_TILE_N = 512    # batch tile when N is large (multiple of 8 sublanes)


def _fc_head_kernel(feats_ref, w1_ref, b1_ref, w2_ref, bias_ref, out_ref):
    # Layer 1: Linear + ReLU  (MXU matmul, VPU add/max)
    h = jnp.dot(feats_ref[...], w1_ref[...], preferred_element_type=jnp.float32)
    h = jnp.maximum(h + b1_ref[...], 0.0)            # (T, F) + (1, F) broadcast
    # Layer 2: Linear; bias already folded with the mean-param offsets.
    out_ref[...] = (
        jnp.dot(h, w2_ref[...], preferred_element_type=jnp.float32)
        + bias_ref[...]                               # (T, 128) + (1, 128)
    )


def prepare_params(params):
    """One-time preprocessing of module parameters for the kernel.

    Folds b2 + init_betas + init_cam into a single lane-padded bias and
    zero-pads w2 to a 128-lane output so the kernel store is unmasked.
    """
    w1 = params["w1"].astype(jnp.float32)                      # (C, F)
    b1 = params["b1"].reshape(1, -1).astype(jnp.float32)       # (1, F)
    F = w1.shape[1]

    init13 = jnp.concatenate(
        [params["init_betas"].reshape(1, 10), params["init_cam"].reshape(1, 3)],
        axis=1,
    ).astype(jnp.float32)                                      # (1, 13)
    bias13 = params["b2"].reshape(1, 13).astype(jnp.float32) + init13

    w2_pad = jnp.zeros((F, _OUT_PAD), jnp.float32)
    w2_pad = w2_pad.at[:, :13].set(params["w2"].astype(jnp.float32))
    bias_pad = jnp.zeros((1, _OUT_PAD), jnp.float32)
    bias_pad = bias_pad.at[:, :13].set(bias13)

    return {"w1": w1, "b1": b1, "w2_pad": w2_pad, "bias_pad": bias_pad}


def fc_head_smplx_forward(feats, num_samples, prepared):
    """Returns (pred_betas, pred_cam) matching the PyTorch module semantics.

    feats: (N, C) float32
    pred_betas: (N, num_samples, 10), pred_cam: (N, num_samples, 3)
    """
    w1, b1 = prepared["w1"], prepared["b1"]
    w2_pad, bias_pad = prepared["w2_pad"], prepared["bias_pad"]
    N, C = feats.shape
    F = w1.shape[1]

    # Batch tiling: small N -> single full-array block; large N -> _TILE_N-row
    # tiles (multiple of 8 sublanes) pipelined/parallelized over the grid.
    if N <= _TILE_N:
        tile_n = N
        n_pad = N
        feats_in = feats
    else:
        tile_n = _TILE_N
        n_pad = pl.cdiv(N, tile_n) * tile_n
        feats_in = feats if n_pad == N else jnp.pad(feats, ((0, n_pad - N), (0, 0)))

    out = pl.pallas_call(
        _fc_head_kernel,
        out_shape=jax.ShapeDtypeStruct((n_pad, _OUT_PAD), jnp.float32),
        grid=(n_pad // tile_n,),
        in_specs=[
            pl.BlockSpec((tile_n, C), lambda i: (i, 0)),       # feats tile
            pl.BlockSpec((C, F), lambda i: (0, 0)),            # w1 (VMEM-resident)
            pl.BlockSpec((1, F), lambda i: (0, 0)),            # b1 (VMEM-resident)
            pl.BlockSpec((F, _OUT_PAD), lambda i: (0, 0)),     # w2 padded
            pl.BlockSpec((1, _OUT_PAD), lambda i: (0, 0)),     # b2+init padded
        ],
        out_specs=pl.BlockSpec((tile_n, _OUT_PAD), lambda i: (i, 0)),
        compiler_params=pltpu.CompilerParams(
            dimension_semantics=("parallel",)),
    )(feats_in, w1, b1, w2_pad, bias_pad)

    out13 = out[:N, :13]
    # reshape(N, 1, 13).repeat(1, num_samples, 1) == broadcast over samples
    offset = jnp.broadcast_to(out13[:, None, :], (N, num_samples, 13))
    pred_betas = offset[:, :, :10]
    pred_cam = offset[:, :, 10:]
    return pred_betas, pred_cam


def init_params(key, in_channels, num_features):
    """Deterministic synthetic parameters matching the module's shapes."""
    k1, k2, k3, k4, k5, k6 = jax.random.split(key, 6)
    # nn.Linear default init: U(-1/sqrt(fan_in), 1/sqrt(fan_in))
    lim1 = 1.0 / np.sqrt(in_channels)
    w1 = jax.random.uniform(k1, (in_channels, num_features), jnp.float32, -lim1, lim1)
    b1 = jax.random.uniform(k2, (num_features,), jnp.float32, -lim1, lim1)
    # layers[2].weight: xavier_uniform_ with gain=0.02
    lim2 = 0.02 * np.sqrt(6.0 / (num_features + 13))
    w2 = jax.random.uniform(k3, (num_features, 13), jnp.float32, -lim2, lim2)
    lim2b = 1.0 / np.sqrt(num_features)
    b2 = jax.random.uniform(k4, (13,), jnp.float32, -lim2b, lim2b)
    # mean_params buffers (synthetic, deterministic): shape (1,1,10) / (1,1,3)
    # TODO(synk): real module loads these from cfg.SMPL.MEAN_PARAMS (.npz file)
    init_betas = jax.random.normal(k5, (1, 1, 10), jnp.float32) * 0.1
    init_cam = jax.random.normal(k6, (1, 1, 3), jnp.float32) * 0.1
    return {"w1": w1, "b1": b1, "w2": w2, "b2": b2,
            "init_betas": init_betas, "init_cam": init_cam}


def _reference(feats, num_samples, p):
    """Pure-JAX reference mirroring the PyTorch forward."""
    h = jnp.maximum(feats @ p["w1"] + p["b1"], 0.0)
    off = (h @ p["w2"] + p["b2"]).reshape(feats.shape[0], 1, 13)
    off = jnp.broadcast_to(off, (feats.shape[0], num_samples, 13))
    return off[:, :, :10] + p["init_betas"], off[:, :, 10:] + p["init_cam"]


if __name__ == "__main__":
    key = jax.random.PRNGKey(0)
    k_feat, k_feat2, k_param = jax.random.split(key, 3)

    C = 32                # fc_head_inchannel (backbone feature dim)
    NUM_FEATURES = 32     # cfg.MODEL.FC_HEAD.NUM_FEATURES
    NUM_SAMPLES = 4       # smpl_params['body_pose'].shape[1]

    params = init_params(k_param, C, NUM_FEATURES)
    prepared = prepare_params(params)   # hoisted: done once, not per forward

    # --- small batch (single full-array block path) ---
    N = 2
    feats = jax.random.normal(k_feat, (N, C), jnp.float32)
    pred_betas, pred_cam = fc_head_smplx_forward(feats, NUM_SAMPLES, prepared)
    jax.block_until_ready((pred_betas, pred_cam))
    ref_betas, ref_cam = _reference(feats, NUM_SAMPLES, params)
    assert pred_betas.shape == (N, NUM_SAMPLES, 10)
    assert pred_cam.shape == (N, NUM_SAMPLES, 3)
    np.testing.assert_allclose(np.asarray(pred_betas), np.asarray(ref_betas),
                               rtol=1e-5, atol=1e-5)
    np.testing.assert_allclose(np.asarray(pred_cam), np.asarray(ref_cam),
                               rtol=1e-5, atol=1e-5)

    # --- larger batch (exercises N-tiling + padding path) ---
    N2 = 600
    feats2 = jax.random.normal(k_feat2, (N2, C), jnp.float32)
    pb2, pc2 = fc_head_smplx_forward(feats2, NUM_SAMPLES, prepared)
    jax.block_until_ready((pb2, pc2))
    rb2, rc2 = _reference(feats2, NUM_SAMPLES, params)
    np.testing.assert_allclose(np.asarray(pb2), np.asarray(rb2),
                               rtol=1e-5, atol=1e-5)
    np.testing.assert_allclose(np.asarray(pc2), np.asarray(rc2),
                               rtol=1e-5, atol=1e-5)

    print("KERNEL_OK")
</pallas_src>

<mosaic_0001>
module attributes {stable_mosaic.version = 11 : i64} {
  func.func @_fc_head_kernel(%arg0: i32, %arg1: memref<2x32xf32, #tpu.memory_space<vmem>>, %arg2: memref<32x32xf32, #tpu.memory_space<vmem>>, %arg3: memref<1x32xf32, #tpu.memory_space<vmem>>, %arg4: memref<32x128xf32, #tpu.memory_space<vmem>>, %arg5: memref<1x128xf32, #tpu.memory_space<vmem>>, %arg6: memref<2x128xf32, #tpu.memory_space<vmem>>) attributes {dimension_semantics = [#tpu.dimension_semantics<parallel>], iteration_bounds = array<i64: 1>, scalar_prefetch = 0 : i64, scratch_operands = 0 : i64, tpu.core_type = #tpu.core_type<tc>, window_params = [{transform_indices = @transform_0, window_bounds = array<i64: 2, 32>}, {pipeline_mode = #tpu.pipeline_mode<synchronous>, transform_indices = @transform_1, window_bounds = array<i64: 32, 32>}, {pipeline_mode = #tpu.pipeline_mode<synchronous>, transform_indices = @transform_2, window_bounds = array<i64: 1, 32>}, {pipeline_mode = #tpu.pipeline_mode<synchronous>, transform_indices = @transform_3, window_bounds = array<i64: 32, 128>}, {pipeline_mode = #tpu.pipeline_mode<synchronous>, transform_indices = @transform_4, window_bounds = array<i64: 1, 128>}, {transform_indices = @transform_5, window_bounds = array<i64: 2, 128>}]} {
    %c0 = arith.constant 0 : index
    %c0_0 = arith.constant 0 : index
    %0 = vector.load %arg1[%c0, %c0_0] : memref<2x32xf32, #tpu.memory_space<vmem>>, vector<2x32xf32>
    %c0_1 = arith.constant 0 : index
    %c0_2 = arith.constant 0 : index
    %1 = vector.load %arg2[%c0_1, %c0_2] : memref<32x32xf32, #tpu.memory_space<vmem>>, vector<32x32xf32>
    %cst = arith.constant dense<0.000000e+00> : vector<2x32xf32>
    %2 = tpu.matmul %0, %1, %cst {dimension_numbers = #tpu.dot_dimension_numbers<[1], [0], [0], [1], [0, 0, 1, 1], [], []>} : vector<2x32xf32>, vector<32x32xf32>, vector<2x32xf32> -> vector<2x32xf32>
    %c0_3 = arith.constant 0 : index
    %c0_4 = arith.constant 0 : index
    %3 = vector.load %arg3[%c0_3, %c0_4] : memref<1x32xf32, #tpu.memory_space<vmem>>, vector<1x32xf32>
    %4 = vector.broadcast %3 : vector<1x32xf32> to vector<2x32xf32>
    %5 = arith.addf %2, %4 : vector<2x32xf32>
    %cst_5 = arith.constant 0.000000e+00 : f32
    %6 = vector.broadcast %cst_5 : f32 to vector<2x32xf32>
    %7 = arith.maximumf %5, %6 : vector<2x32xf32>
    %c0_6 = arith.constant 0 : index
    %c0_7 = arith.constant 0 : index
    %8 = vector.load %arg4[%c0_6, %c0_7] : memref<32x128xf32, #tpu.memory_space<vmem>>, vector<32x128xf32>
    %cst_8 = arith.constant dense<0.000000e+00> : vector<2x128xf32>
    %9 = tpu.matmul %7, %8, %cst_8 {dimension_numbers = #tpu.dot_dimension_numbers<[1], [0], [0], [1], [0, 0, 1, 1], [], []>} : vector<2x32xf32>, vector<32x128xf32>, vector<2x128xf32> -> vector<2x128xf32>
    %c0_9 = arith.constant 0 : index
    %c0_10 = arith.constant 0 : index
    %10 = vector.load %arg5[%c0_9, %c0_10] : memref<1x128xf32, #tpu.memory_space<vmem>>, vector<1x128xf32>
    %11 = vector.broadcast %10 : vector<1x128xf32> to vector<2x128xf32>
    %12 = arith.addf %9, %11 : vector<2x128xf32>
    %c0_11 = arith.constant 0 : index
    %c0_12 = arith.constant 0 : index
    %13 = vector.load %arg6[%c0_11, %c0_12] : memref<2x128xf32, #tpu.memory_space<vmem>>, vector<2x128xf32>
    tpu.vector_store %arg6[%c0_11, %c0_12], %12 {strides = array<i32>} : memref<2x128xf32, #tpu.memory_space<vmem>>, vector<2x128xf32>,
    return
  }
  func.func @transform_0(%arg0: i32) -> (i32, i32) {
    %c0_i32 = arith.constant 0 : i32
    %c0_i32_0 = arith.constant 0 : i32
    return %arg0, %c0_i32 : i32, i32
  }
  func.func @transform_1(%arg0: i32) -> (i32, i32) {
    %c0_i32 = arith.constant 0 : i32
    %c0_i32_0 = arith.constant 0 : i32
    %c0_i32_1 = arith.constant 0 : i32
    return %c0_i32, %c0_i32_0 : i32, i32
  }
  func.func @transform_2(%arg0: i32) -> (i32, i32) {
    %c0_i32 = arith.constant 0 : i32
    %c0_i32_0 = arith.constant 0 : i32
    %c0_i32_1 = arith.constant 0 : i32
    return %c0_i32, %c0_i32_0 : i32, i32
  }
  func.func @transform_3(%arg0: i32) -> (i32, i32) {
    %c0_i32 = arith.constant 0 : i32
    %c0_i32_0 = arith.constant 0 : i32
    %c0_i32_1 = arith.constant 0 : i32
    return %c0_i32, %c0_i32_0 : i32, i32
  }
  func.func @transform_4(%arg0: i32) -> (i32, i32) {
    %c0_i32 = arith.constant 0 : i32
    %c0_i32_0 = arith.constant 0 : i32
    %c0_i32_1 = arith.constant 0 : i32
    return %c0_i32, %c0_i32_0 : i32, i32
  }
  func.func @transform_5(%arg0: i32) -> (i32, i32) {
    %c0_i32 = arith.constant 0 : i32
    %c0_i32_0 = arith.constant 0 : i32
    return %arg0, %c0_i32 : i32, i32
  }
}

</mosaic_0001>

<bundles_post_ra>
// kernel: tpu_custom_call.1
= control target key start
LH: loop header
LB: loop body
LE: loop exit
PB: predicated region body
PF: predicated region fallthrough
CT: control target
= control target key end

     0   :  { %10 = vsyncpa [#allocation3], 0  ;;  %s316_s0 = inlined_call_operand.hbm [shape: f32[2,32], index: 0, kind: input, shape index: {}]   ;;  %s317_s1 = inlined_call_operand.hbm [shape: f32[32,32], index: 1, kind: input, shape index: {}]   ;;  %s318_s2 = inlined_call_operand.vmem [shape: f32[1,32], index: 2, kind: input, shape index: {}]   ;;  %s319_s3 = inlined_call_operand.hbm [shape: f32[32,128], index: 3, kind: input, shape index: {}]   ;;  %s320_s4 = inlined_call_operand.vmem [shape: f32[1,128], index: 4, kind: input, shape index: {}]   ;;  %s321_s5 = inlined_call_operand.hbm [shape: f32[2,128], index: 5, kind: output, shape index: {}]  }
   0x1   :  { %11 = vsyncpa [#allocation6], 0  ;;  %s28_s20 = sshll.u32 %s317_s1, 4  ;;  %s29_s20 = int_to_ptr.hbm [resolvable:$true] %s28_s20 }
   0x2   :  { %12 = vsyncpa [#allocation4], 0  ;;  %s262_s21 = smov [#allocation5]   ;;  %s18_s25 = sshll.u32 %s316_s0, 4  ;;  %s19_s25 = int_to_ptr.hbm [resolvable:$true] %s18_s25 }
   0x3   :  { %s30_s22 = sshll.u32 %s262_s21, 4  ;;  %s263_s26 = smov 128   ;;  %s31_s22 = int_to_ptr.vmem [resolvable:$true] %s30_s22 }
   0x4   :  { %s264_s27 = smov 8   ;;  %s265_s28 = smov [#allocation2]  }
   0x5   :  { %36 = dma.hbm_to_vmem [thread:$0]  %s29_s20, 512, %s31_s22, [#allocation6], %s263_s26, %s263_s26, %s264_s27  }
   0x6   :  { %s20_s29 = sshll.u32 %s265_s28, 4  ;;  %s43_s7 = sshll.u32 %s319_s3, 4  ;;  %s21_s29 = int_to_ptr.vmem [resolvable:$true] %s20_s29  ;;  %s44_s7 = int_to_ptr.hbm [resolvable:$true] %s43_s7 }
   0x7   :  { %23 = dma.hbm_to_vmem [thread:$0]  %s19_s25, 32, %s21_s29, [#allocation3]  }
   0x8   :  { %s266_s1 = smov [#allocation7]  }
   0x9   :  { %s45_s8 = sshll.u32 %s266_s1, 4  ;;  %s46_s8 = int_to_ptr.vmem [resolvable:$true] %s45_s8 }
   0xa   :  { %51 = dma.hbm_to_vmem [thread:$0]  %s44_s7, 512, %s46_s8, [#allocation6], %s263_s26, %s263_s26, %s264_s27  }
   0xb   :  { %256 = dma.done.wait [#allocation3], 32  }
   0xc   :  { %257 = vsyncadd [#allocation3], 4294967264 }
   0xd   :  { %258 = dma.done.wait [#allocation6], 1024  }
   0xe   :  { %259 = vsyncadd [#allocation6], 4294966272  ;;  %v70_v0 = vld [vmem:[#allocation5 + $0x18] sm:$0xff]  ;;  %v69_v1 = vld [vmem:[#allocation5 + $0x10] sm:$0xff]  ;;  %vm75_vm0 = vcmask 261120   ;;  %s267_s11 = smov [#allocation8]  }
   0xf   :  { %91 = vmatpush.msra.mxu0 %v70_v0  ;;  %v103_v2 = vld [vmem:[#allocation7 + $0x18] sm:$0xff]  ;;  %v68_v3 = vld [vmem:[#allocation5 + $0x8] sm:$0xff]  ;;  %v67_v4 = vld [vmem:[#allocation5] sm:$0xff]  ;;  %s137_s12 = sshll.u32 %s267_s11, 4  ;;  %s139_s15 = sshll.u32 %s321_s5, 4  ;;  %s138_s12 = int_to_ptr.vmem [resolvable:$true] %s137_s12  ;;  %s140_s15 = int_to_ptr.hbm [resolvable:$true] %s139_s15 }
  0x10   :  { %123 = vmatpush.msra.mxu1 %v103_v2  ;;  %v66_v5 = vld [vmem:[#allocation2] sm:$0x3]  ;;  %v102_v6 = vld [vmem:[#allocation7 + $0x10] sm:$0xff]  ;;  %v101_v7 = vld [vmem:[#allocation7 + $0x8] sm:$0xff] }
  0x11   :  { %92 = vmatpush.msra.mxu0 %v69_v1  ;;  %v100_v8 = vld [vmem:[#allocation7] sm:$0xff]  ;;  %v158_v9 = vld [vmem:[%s318_s2] ss:$0 sm:$0xff] }
  0x12   :  { %124 = vmatpush.msra.mxu1 %v102_v6  ;;  %v159_v13 = vld [vmem:[%s320_s4] ss:$0 sm:$0xff] }
  0x13   :  { %93 = vmatpush.msra.mxu0 %v68_v3 }
  0x14   :  { %125 = vmatpush.msra.mxu1 %v101_v7 }
  0x15   :  { %94 = vmatpush.msra.mxu0 %v67_v4 }
  0x16   :  { %150 = vmatmul.msk.f32.vlgmr.msra.gmra.mxu0 %vm75_vm0, %v66_v5  ;;  %126 = vmatpush.msra.mxu1 %v100_v8 }
  0x93   :  { %v96_v10 = vpop.f32.mrf.mxu0 }
  0x94   :  { %v97_v11 = vadd.f32 %v158_v9, %v96_v10 }
  0x96   :  { %v99_v12 = vmax.f32 %v97_v11, 0.0 }
  0x98   :  { %151 = vmatmul.msk.f32.vlgmr.msra.gmra.mxu1 %vm75_vm0, %v99_v12 }
 0x115   :  { %v128_v14 = vpop.f32.mrf.mxu1 }
 0x116   :  { %v129_v15 = vadd.f32 %v159_v13, %v128_v14 }
 0x118   :  { %131 = vst [vmem:[#allocation8] sm:$0x3] %v129_v15 }
 0x119   :  { %142 = dma.vmem_to_hbm [thread:$0]  %s138_s12, 32, %s140_s15, [#allocation4]  }
 0x11a   :  { %260 = dma.done.wait [#allocation4], 32  }
 0x11b   :  { %261 = vsyncadd [#allocation4], 4294967264 }
 0x11c   :  { %147 = vsyncpa [#allocation3], 1 }
 0x11d   :  { %148 = vsyncpa [#allocation6], 1 }
 0x11e   :  { %149 = vsyncpa [#allocation4], 1 }

</bundles_post_ra>
